<compile_context>
chip_gen: v5e
topology: v5e:2x2
jax: 0.10.0
libtpu: 0.0.40
codegen_flags: <defaults>
</compile_context>

<pallas_src>
import functools

import jax
import jax.numpy as jnp
from jax.experimental import pallas as pl
from jax.experimental.pallas import tpu as pltpu


def _norm_kernel(x_ref, alpha_ref, bias_ref, o_ref, *, d_model, eps):
    x = x_ref[...].astype(jnp.float32)                      # (TR, D)

    # Two independent cross-lane reductions (XLU slot), single pass over x.
    s1 = jnp.sum(x, axis=-1, keepdims=True)                 # sum(x)
    s2 = jnp.sum(x * x, axis=-1, keepdims=True)             # sum(x^2)
    mean = s1 * (1.0 / d_model)
    # sum((x-mean)^2) = sum(x^2) - sum(x)^2 / d; clamp tiny negative cancellation.
    var = jnp.maximum(s2 - mean * s1, 0.0) * (1.0 / max(d_model - 1, 1))
    denom = jnp.sqrt(var) + eps                             # eps on std (torch semantics)

    # EUP approximate reciprocal + one Newton step on the (TR, 1) column:
    # negligible cost, ~full f32 accuracy.
    r = pl.reciprocal(denom, approx=True)
    inv = r * (2.0 - denom * r)

    alpha = alpha_ref[...]                                   # f32 (1, D), loaded once per tile
    bias = bias_ref[...]
    y = alpha * ((x - mean) * inv) + bias
    o_ref[...] = y.astype(o_ref.dtype)


def norm(x, alpha, bias, *, eps=1e-6, target_block_bytes=2 << 20):
    """Pallas implementation of Norm.forward; normalizes over the last dim."""
    orig_shape = x.shape
    d_model = orig_shape[-1]

    x2 = x.reshape(-1, d_model)          # free reshape (collapse leading dims)
    n_rows = x2.shape[0]

    itemsize = jnp.dtype(x2.dtype).itemsize
    row_bytes = max(d_model * itemsize, 1)

    # Row tile sized so the x block is ~target_block_bytes, sublane multiple of 8.
    tr = (target_block_bytes // row_bytes) // 8 * 8
    tr = max(8, min(2048, tr))
    if tr >= n_rows:
        tr = n_rows                      # block == full dim is always legal
    # Ensure >= 2 grid steps when there are enough rows (v7x megacore sharding).
    if n_rows >= 16 and pl.cdiv(n_rows, tr) < 2:
        half = -(-n_rows // 2)
        tr2 = ((half + 7) // 8) * 8
        tr = tr2 if tr2 < n_rows else n_rows
    grid = (pl.cdiv(n_rows, tr),)

    # Explicit scoped-VMEM budget: double-buffered in+out blocks + f32 temps,
    # capped below v7x's 64 MiB physical VMEM, raised above v5e's 16 MiB default.
    blk_io = tr * d_model * itemsize
    blk_f32 = tr * d_model * 4
    est = 4 * blk_io + 4 * blk_f32 + (256 << 10)
    vmem_limit = int(min(48 << 20, max(24 << 20, est)))

    # Keep parameters in f32 (tiny arrays; avoids dropping precision for bf16 x).
    alpha_f = jnp.asarray(alpha, jnp.float32).reshape(1, d_model)
    bias_f = jnp.asarray(bias, jnp.float32).reshape(1, d_model)

    kernel = functools.partial(_norm_kernel, d_model=d_model, eps=eps)

    out = pl.pallas_call(
        kernel,
        out_shape=jax.ShapeDtypeStruct((n_rows, d_model), x.dtype),
        grid=grid,
        in_specs=[
            pl.BlockSpec((tr, d_model), lambda i: (i, 0)),   # x row tile
            pl.BlockSpec((1, d_model), lambda i: (0, 0)),    # alpha (resident)
            pl.BlockSpec((1, d_model), lambda i: (0, 0)),    # bias  (resident)
        ],
        out_specs=pl.BlockSpec((tr, d_model), lambda i: (i, 0)),
        compiler_params=pltpu.CompilerParams(
            dimension_semantics=("parallel",),
            vmem_limit_bytes=vmem_limit),
    )(x2, alpha_f, bias_f)

    return out.reshape(orig_shape)


if __name__ == "__main__":
    B, S, D = 2, 8, 32
    eps = 1e-6

    key = jax.random.PRNGKey(0)
    x = jax.random.normal(key, (B, S, D), jnp.float32)

    # Module default initialization: alpha = ones, bias = zeros.
    alpha = jnp.ones((D,), jnp.float32)
    bias = jnp.zeros((D,), jnp.float32)

    out = norm(x, alpha, bias, eps=eps)
    jax.block_until_ready(out)
    assert out.shape == (B, S, D)

    # Pure-JAX reference matching torch semantics (unbiased std, eps on std).
    mean = x.mean(axis=-1, keepdims=True)
    var = jnp.sum((x - mean) ** 2, axis=-1, keepdims=True) / (D - 1)
    ref = alpha * (x - mean) / (jnp.sqrt(var) + eps) + bias
    err = float(jnp.max(jnp.abs(out - ref)))
    assert err < 1e-4, err

    print("KERNEL_OK")
</pallas_src>

<mosaic_0001>
module attributes {stable_mosaic.version = 11 : i64} {
  func.func @_norm_kernel(%arg0: i32, %arg1: memref<8x32xf32, #tpu.memory_space<vmem>>, %arg2: memref<1x32xf32, #tpu.memory_space<vmem>>, %arg3: memref<1x32xf32, #tpu.memory_space<vmem>>, %arg4: memref<8x32xf32, #tpu.memory_space<vmem>>) attributes {dimension_semantics = [#tpu.dimension_semantics<parallel>], iteration_bounds = array<i64: 2>, scalar_prefetch = 0 : i64, scratch_operands = 0 : i64, tpu.core_type = #tpu.core_type<tc>, window_params = [{transform_indices = @transform_0, window_bounds = array<i64: 8, 32>}, {pipeline_mode = #tpu.pipeline_mode<synchronous>, transform_indices = @transform_1, window_bounds = array<i64: 1, 32>}, {pipeline_mode = #tpu.pipeline_mode<synchronous>, transform_indices = @transform_2, window_bounds = array<i64: 1, 32>}, {transform_indices = @transform_3, window_bounds = array<i64: 8, 32>}]} {
    %c0 = arith.constant 0 : index
    %c0_0 = arith.constant 0 : index
    %0 = vector.load %arg1[%c0, %c0_0] : memref<8x32xf32, #tpu.memory_space<vmem>>, vector<8x32xf32>
    %cst = arith.constant dense<0.000000e+00> : vector<8xf32>
    %1 = vector.multi_reduction <add>, %0, %cst [1] : vector<8x32xf32> to vector<8xf32>
    %2 = vector.shape_cast %1 : vector<8xf32> to vector<8x1xf32>
    %3 = arith.mulf %0, %0 : vector<8x32xf32>
    %cst_1 = arith.constant dense<0.000000e+00> : vector<8xf32>
    %4 = vector.multi_reduction <add>, %3, %cst_1 [1] : vector<8x32xf32> to vector<8xf32>
    %5 = vector.shape_cast %4 : vector<8xf32> to vector<8x1xf32>
    %cst_2 = arith.constant 3.125000e-02 : f32
    %6 = vector.broadcast %cst_2 : f32 to vector<8x1xf32>
    %7 = arith.mulf %2, %6 : vector<8x1xf32>
    %8 = arith.mulf %7, %2 : vector<8x1xf32>
    %9 = arith.subf %5, %8 : vector<8x1xf32>
    %cst_3 = arith.constant 0.000000e+00 : f32
    %10 = vector.broadcast %cst_3 : f32 to vector<8x1xf32>
    %11 = arith.maximumf %9, %10 : vector<8x1xf32>
    %cst_4 = arith.constant 0.0322580636 : f32
    %12 = vector.broadcast %cst_4 : f32 to vector<8x1xf32>
    %13 = arith.mulf %11, %12 : vector<8x1xf32>
    %14 = math.sqrt %13 : vector<8x1xf32>
    %cst_5 = arith.constant 9.99999997E-7 : f32
    %15 = vector.broadcast %cst_5 : f32 to vector<8x1xf32>
    %16 = arith.addf %14, %15 : vector<8x1xf32>
    %17 = tpu.reciprocal %16 {approx = true} : vector<8x1xf32> -> vector<8x1xf32>
    %18 = arith.mulf %16, %17 : vector<8x1xf32>
    %cst_6 = arith.constant 2.000000e+00 : f32
    %19 = vector.broadcast %cst_6 : f32 to vector<8x1xf32>
    %20 = arith.subf %19, %18 : vector<8x1xf32>
    %21 = arith.mulf %17, %20 : vector<8x1xf32>
    %c0_7 = arith.constant 0 : index
    %c0_8 = arith.constant 0 : index
    %22 = vector.load %arg2[%c0_7, %c0_8] : memref<1x32xf32, #tpu.memory_space<vmem>>, vector<1x32xf32>
    %c0_9 = arith.constant 0 : index
    %c0_10 = arith.constant 0 : index
    %23 = vector.load %arg3[%c0_9, %c0_10] : memref<1x32xf32, #tpu.memory_space<vmem>>, vector<1x32xf32>
    %24 = vector.broadcast %7 : vector<8x1xf32> to vector<8x32xf32>
    %25 = arith.subf %0, %24 : vector<8x32xf32>
    %26 = vector.broadcast %21 : vector<8x1xf32> to vector<8x32xf32>
    %27 = arith.mulf %25, %26 : vector<8x32xf32>
    %28 = vector.broadcast %22 : vector<1x32xf32> to vector<8x32xf32>
    %29 = arith.mulf %28, %27 : vector<8x32xf32>
    %30 = vector.broadcast %23 : vector<1x32xf32> to vector<8x32xf32>
    %31 = arith.addf %29, %30 : vector<8x32xf32>
    %c0_11 = arith.constant 0 : index
    %c0_12 = arith.constant 0 : index
    %32 = vector.load %arg4[%c0_11, %c0_12] : memref<8x32xf32, #tpu.memory_space<vmem>>, vector<8x32xf32>
    tpu.vector_store %arg4[%c0_11, %c0_12], %31 {strides = array<i32>} : memref<8x32xf32, #tpu.memory_space<vmem>>, vector<8x32xf32>,
    return
  }
  func.func @transform_0(%arg0: i32) -> (i32, i32) {
    %c0_i32 = arith.constant 0 : i32
    %c0_i32_0 = arith.constant 0 : i32
    return %arg0, %c0_i32 : i32, i32
  }
  func.func @transform_1(%arg0: i32) -> (i32, i32) {
    %c0_i32 = arith.constant 0 : i32
    %c0_i32_0 = arith.constant 0 : i32
    %c0_i32_1 = arith.constant 0 : i32
    return %c0_i32, %c0_i32_0 : i32, i32
  }
  func.func @transform_2(%arg0: i32) -> (i32, i32) {
    %c0_i32 = arith.constant 0 : i32
    %c0_i32_0 = arith.constant 0 : i32
    %c0_i32_1 = arith.constant 0 : i32
    return %c0_i32, %c0_i32_0 : i32, i32
  }
  func.func @transform_3(%arg0: i32) -> (i32, i32) {
    %c0_i32 = arith.constant 0 : i32
    %c0_i32_0 = arith.constant 0 : i32
    return %arg0, %c0_i32 : i32, i32
  }
}

</mosaic_0001>

<bundles_post_ra>
// kernel: tpu_custom_call.1
= control target key start
LH: loop header
LB: loop body
LE: loop exit
PB: predicated region body
PF: predicated region fallthrough
CT: control target
= control target key end

     0   :  { %8 = vsyncpa [#allocation3], 0  ;;  %s721_s0 = inlined_call_operand.hbm [shape: f32[16,32], index: 0, kind: input, shape index: {}]   ;;  %s722_s1 = inlined_call_operand.hbm [shape: f32[1,32], index: 1, kind: input, shape index: {}]   ;;  %s723_s2 = inlined_call_operand.vmem [shape: f32[1,32], index: 2, kind: input, shape index: {}]   ;;  %s724_s3 = inlined_call_operand.hbm [shape: f32[16,32], index: 3, kind: output, shape index: {}]  }
   0x1   :  { %10 = vsyncpa [#allocation3 + $0x1], 0 }
   0x2   :  { %11 = vsyncpa [#allocation6], 0 }
   0x3   :  { %12 = vsyncpa [#allocation4], 0 }
   0x4   :  { %14 = vsyncpa [#allocation4 + $0x1], 0  ;;  %s573_s12 = smov 0   ;;  %s575_s13 = smov 0  }
   0x5   :  { %s577_s14 = smov 0   ;;  %s579_s15 = smov 0  }
   0x6 LB: > { %s594_s16 = sadd.s32 4294967295, %s550_s15   ;;  %s343_s17 = sadd.s32 4294967294, %s550_s15   ;;  %s550_s15 = sphi %s579_s15, %s734_s15   ;;  %s546_s14 = sphi %s577_s14, %s733_s14   ;;  %s542_s13 = sphi %s575_s13, %s732_s13   ;;  %s538_s12 = sphi %s573_s12, %s731_s12  }
   0x7   : > { %p40_p0 = scmp.ne.s32.totalorder %s542_s13, %s538_s12  ;;  %p41_p1 = scmp.eq.s32.totalorder %s594_s16, 0 }
   0x8   : > { %p106_p2 = scmp.eq.s32.totalorder %s594_s16, 1  ;;  %p112_p3 = scmp.eq.s32.totalorder %s343_s17, 1 }
   0x9   : > { %p603_p4 = por %p41_p1, %p40_p0  ;;  %p344_p5 = scmp.ge.s32.totalorder %s550_s15, 1 }
   0xa   : > { %p608_p6 = por %p112_p3, %p40_p0  ;;  %p119_p7 = scmp.lt.s32.totalorder %s550_s15, 3 }
   0xb   : > { %s131_s22 = sshll.u32 %s722_s1, 4  ;;  %s552_s24 = smov [#allocation5]   ;;  %s132_s22 = int_to_ptr.hbm [resolvable:$true] %s131_s22 }
   0xc   : > { %p616_p8 = pnand %p344_p5, %p119_p7  ;;  %s133_s25 = sshll.u32 %s552_s24, 4  ;;  %s134_s25 = int_to_ptr.vmem [resolvable:$true] %s133_s25 }
   0xd   : > { %s626_s26 = sadd.s32 1, %s550_s15   ;;  %s27_s27 = sadd.s32 1, %s546_s14 }
   0xe   : > { %p365_p10 = pneg %p616_p8  ;;  %s24_s28 = ssub.s32 %s550_s15, %s626_s26 }
   0xf   : > { %p25_p12 = scmp.eq.s32.totalorder %s24_s28, 0  ;;  %p34_p13 = scmp.ne.s32.totalorder %s546_s14, %s542_s13 }
  0x10   : > { %p366_p11 = pnand %p365_p10, %p41_p1  ;;  %p35_p0 = scmp.eq.s32.totalorder %s550_s15, 0 }
  0x11   : > { %s635_s29 = scalar_select %p25_p12, %s546_s14, %s27_s27  }
  0x12   : > { %368 = dma.hbm_to_vmem [thread:$0]  (!%p366_p11), %s132_s22, 16, %s134_s25, [#allocation6]  }
  0x13   : > { %p639_p3 = por %p106_p2, %p34_p13  ;;  %p378_p5 = scmp.lt.s32.totalorder %s550_s15, 2 }
  0x14   : > { %s147_s4 = sand.u32 1, %s546_s14   ;;  %s348_s5 = sshll.u32 %s550_s15, 3 }
  0x15   : > { %p36_p7 = por %p35_p0, %p34_p13  ;;  %s347_s6 = sshll.u32 %s147_s4, 3 }
  0x16   : > { %s155_s9 = scalar_lea.hbm %s721_s0, %s348_s5  ;;  %s151_s11 = scalar_lea.vmem [#allocation2], %s347_s6 }
  0x17   : > { %s157_s10 = sshll.u32 %s155_s9, 4  ;;  %s159_s17 = sshll.u32 %s151_s11, 4  ;;  %s158_s10 = int_to_ptr.hbm [resolvable:$true] %s157_s10  ;;  %s160_s17 = int_to_ptr.vmem [resolvable:$true] %s159_s17 }
  0x18   : > { %p649_p10 = pnand %p378_p5, %p36_p7  ;;  %s148_s21 = scalar_lea.sflag [#allocation3], %s147_s4 }
  0x19   : > { %s450_s22 = sshra.s32 %s158_s10, 4  ;;  %s457_s28 = scalar_lea.hbm %s721_s0, 16  ;;  %s451_s22 = int_to_ptr.hbm [resolvable:$true] %s450_s22 }
  0x1a   : > { %s452_s24 = scalar_lea.hbm %s451_s22, 8  ;;  %p454_p11 = pneg %p649_p10 }
  0x1b   : > { %p453_p2 = scmp.ne.s32.totalorder %s451_s22, %s452_s24  ;;  %p458_p0 = scmp.lt.s32.totalorder %s451_s22, %s721_s0 }
  0x1c   : > { %p459_p5 = scmp.lt.s32.totalorder %s457_s28, %s452_s24 }
  0x1d   : > { %p455_p12 = pnand %p454_p11, %p453_p2 }
  0x1e   : > { %p460_p7 = por %p459_p5, %p458_p0 }
  0x1f   : > { %p456_p13 = pneg %p455_p12 }
  0x21   : > { %p461_p9 = pnand %p460_p7, %p456_p13 }
  0x23   : > { %464 = shalt.err (!%p461_p9)
}
  0x24   : > { %372 = dma.hbm_to_vmem [thread:$0]  (!%p649_p10), %s158_s10, 128, %s160_s17, %s148_s21  }
  0x25   : > { %168 = sbr.rel (%p616_p8) target bundleno = 222 (0xde), region = 32  ;;  %s666_s4 = sand.u32 (!%p616_p8), 1, %s542_s13  }
  0x26   : > { %s350_s7 = sshll.u32 (!%p616_p8), %s666_s4, 3  ;;  %s171_s8 = scalar_lea.sflag (!%p616_p8), [#allocation3], %s666_s4 }
  0x27   : > { %s174_s9 = scalar_lea.vmem (!%p616_p8), [#allocation2], %s350_s7 }
  0x2a   : > { %525 = dma.done.wait (%p603_p4), %s171_s8, 128  }
  0x2b   : > { %527 = vsyncadd (%p603_p4), %s171_s8, 4294967168 }
  0x2c   : > { %529 = dma.done.wait (%p41_p1), [#allocation6], 16  }
  0x2d   : > { %531 = vsyncadd (%p41_p1), [#allocation6], 4294967280  ;;  %vm204_vm0 = vcmask 261120   ;;  %v203_v0 = vld [vmem:[%s174_s9] sm:$0xff]  ;;  %s354_s18 = sshll.u32 %s594_s16, 3  ;;  %s202_s21 = scalar_lea.vmem [#allocation7], %s350_s7 }
  0x2e   : > { %v205_v1 = vsel %vm204_vm0, %v203_v0, 0.0  ;;  %v208_v2 = vmul.f32 %v203_v0, %v203_v0  ;;  %v414_v27 = vld [vmem:[#allocation5] ss:$0 sm:$0xff]  ;;  %s258_s11 = scalar_lea.hbm %s724_s3, %s354_s18  ;;  %v415_v29 = vld [vmem:[%s723_s2] ss:$0 sm:$0xff]  ;;  %s260_s22 = sshll.u32 %s202_s21, 4  ;;  %s261_s22 = int_to_ptr.vmem [resolvable:$true] %s260_s22 }
  0x2f   : > { %206 = vadd.xlane.f32.xlu0 %v205_v1  ;;  %s262_s24 = sshll.u32 %s258_s11, 4  ;;  %s248_s16 = scalar_lea.sflag [#allocation4], %s666_s4  ;;  %s263_s24 = int_to_ptr.hbm [resolvable:$true] %s262_s24 }
  0x30   : > { %v209_v3 = vsel %vm204_vm0, %v208_v2, 0.0  ;;  %s494_s25 = sshra.s32 %s263_s24, 4  ;;  %s500_s6 = scalar_lea.hbm %s724_s3, 16  ;;  %s495_s25 = int_to_ptr.hbm [resolvable:$true] %s494_s25 }
  0x31   : > { %s496_s27 = scalar_lea.hbm %s495_s25, 8  ;;  %p501_p9 = scmp.lt.s32.totalorder %s495_s25, %s724_s3 }
  0x32   : > { %p497_p1 = scmp.ne.s32.totalorder %s495_s25, %s496_s27  ;;  %p502_p10 = scmp.lt.s32.totalorder %s500_s6, %s496_s27 }
  0x34   : > { %p498_p4 = pnand %p497_p1, %p639_p3  ;;  %p503_p2 = por %p502_p10, %p501_p9 }
  0x36   : > { %p499_p8 = pneg %p498_p4 }
  0x37   : > { %210 = vadd.xlane.f32.xlu0 %v209_v3 }
  0x38   : > { %p504_p11 = pnand %p503_p2, %p499_p8 }
  0xa2   : > { %v207_v4 = vpop.xlane.xlu0 %206 }
  0xa3   : > { %v212_v5 = vmul.f32 0.03125, %v207_v4 }
  0xa5   : > { %v213_v6 = vmul.f32 %v212_v5, %v207_v4  ;;  %v236_v25 = vsub.f32 %v203_v0, %v212_v5 }
  0xaa   : > { %v211_v7 = vpop.xlane.xlu0 %210 }
  0xab   : > { %v214_v8 = vsub.f32 %v211_v7, %v213_v6 }
  0xad   : > { %v215_v9 = vmax.f32 %v214_v8, 0.0 }
  0xaf   : > { %v216_v10 = vmul.f32 0.032258064, %v215_v9 }
  0xb1   : > { %416 = vrsqrt.f32 %v216_v10  ;;  %vm224_vm1 = vcmp.eq.f32.partialorder %v216_v10, inf  ;;  %v227_v18 = vand.u32 2147483648, %v216_v10  ;;  %vm226_vm2 = vcmp.eq.f32.partialorder %v216_v10, 0.0 }
  0xb7   : > { %v417_v11 = vpop.eup %416 }
  0xb8   : > { %v218_v12 = vmul.f32 %v417_v11, %v216_v10 }
  0xba   : > { %v219_v13 = vmul.f32 %v417_v11, %v218_v12 }
  0xbc   : > { %v220_v14 = vmul.f32 0.5, %v219_v13 }
  0xbe   : > { %v221_v15 = vsub.f32 1.5, %v220_v14 }
  0xc0   : > { %v222_v16 = vmul.f32 %v417_v11, %v221_v15 }
  0xc2   : > { %v223_v17 = vmul.f32 %v222_v16, %v216_v10 }
  0xc4   : > { %v225_v19 = vsel %vm224_vm1, %v216_v10, %v223_v17 }
  0xc5   : > { %v228_v20 = vsel %vm226_vm2, %v227_v18, %v225_v19 }
  0xc6   : > { %v229_v21 = vadd.f32 1e-06, %v228_v20 }
  0xc8   : > { %418 = vrcp.f32 %v229_v21 }
  0xce   : > { %v419_v22 = vpop.eup %418 }
  0xcf   : > { %v231_v23 = vmul.f32 %v419_v22, %v229_v21 }
  0xd1   : > { %v232_v24 = vsub.f32 2.0, %v231_v23 }
  0xd3   : > { %v233_v26 = vmul.f32 %v419_v22, %v232_v24 }
  0xd5   : > { %v237_v28 = vmul.f32 %v236_v25, %v233_v26 }
  0xd7   : > { %v241_v30 = vmul.f32 %v414_v27, %v237_v28 }
  0xd9   : > { %v245_v31 = vadd.f32 %v415_v29, %v241_v30 }
  0xdb   : > { %246 = vst.msk [vmem:[%s202_s21] sm:$0xff] %vm204_vm0, %v245_v31 }
  0xdc   : > { %507 = shalt.err (!%p504_p11)
}
  0xdd   : > { %363 = dma.vmem_to_hbm [thread:$0]  (%p639_p3), %s261_s22, 128, %s263_s24, %s248_s16  }
  0xde PF: > { %s274_s4 = sand.u32 1, %s538_s12   ;;  %p730_p12 = scmp.ge.s32.totalorder %s550_s15, 2 }
  0xdf   : > { %s275_s9 = scalar_lea.sflag [#allocation4], %s274_s4 }
  0xe0   : > { %p374_p13 = pnand %p730_p12, %p608_p6 }
  0xe2   : > { %p375_p0 = pneg %p374_p13 }
  0xe4   : > { %533 = dma.done.wait (%p375_p0), %s275_s9, 128  }
  0xe5   : > { %535 = vsyncadd (%p375_p0), %s275_s9, 4294967168  ;;  %p17_p5 = scmp.ge.s32.totalorder %s626_s26, 4   ;;  %s731_s12 = smov %s542_s13 }
  0xe6   : > { %s732_s13 = smov %s546_s14  ;;  %s733_s14 = smov %s635_s29 }
  0xe7   : > { %s734_s15 = smov %s626_s26  ;;  %19 = sbr.rel (!%p17_p5) target bundleno = 6 (0x6), region = 81 }
  0xec   :  { %281 = vsyncpa [#allocation3], 1 }
  0xed   :  { %283 = vsyncpa [#allocation3 + $0x1], 1 }
  0xee   :  { %284 = vsyncpa [#allocation6], 1 }
  0xef   :  { %285 = vsyncpa [#allocation4], 1 }
  0xf0   :  { %287 = vsyncpa [#allocation4 + $0x1], 1 }

</bundles_post_ra>
